<compile_context>
chip_gen: v7x
topology: tpu7x:2x2x1
jax: 0.10.0
libtpu: 0.0.40
codegen_flags: <defaults>
</compile_context>

<pallas_src>
import jax
import jax.numpy as jnp
from jax.experimental import pallas as pl
from jax.experimental.pallas import tpu as pltpu


def _round_up(x, m):
    return ((x + m - 1) // m) * m


def _chip_config():
    """Per-generation (batch-tile cap, vmem_limit_bytes, force >=2 grid steps)."""
    try:
        kind = jax.devices()[0].device_kind.lower()
    except Exception:
        kind = ""
    if "v7" in kind or "7x" in kind:
        # v7x: 2 TensorCores, 64 MiB physical VMEM -> leave headroom, split grid.
        return 8192, 48 << 20, True
    if "v6" in kind:
        # v6e: 1 TC, 128 MiB physical VMEM (32 MiB scoped default).
        return 8192, 64 << 20, False
    # v5e / unknown: stay under the 16 MiB scoped default, no override needed.
    return 2048, None, False


def head_kernel_c1(x_ref, w1_ref, b1_ref, w2_ref, b2_ref, o_ref):
    """num_classes == 1 path with a lane-dense (1, TB) output row."""
    # x_ref : (TB, D_in) f32  -> cast to bf16 here (no wrapper-side copy)
    # w1_ref: (D_in, H)  bf16
    # b1_ref: (1, H)     f32
    # w2_ref: (1, H)     f32   fc2 weight as a row
    # b2_ref: (1, 1)     f32
    # o_ref : (1, 1, TB) f32   lane-dense output (batch on the lane axis)
    x = x_ref[...].astype(w1_ref.dtype)
    h = jnp.dot(x, w1_ref[...], preferred_element_type=jnp.float32)
    h = jnp.maximum(h + b1_ref[...], 0.0)
    # (1, H) . (TB, H)^T -> (1, TB): output is produced directly in lane-dense
    # row form (no (TB,1)->(1,TB) relayout, no masked/strided stores).
    row = jnp.einsum("ch,bh->cb", w2_ref[...], h,
                     preferred_element_type=jnp.float32)
    row = row + b2_ref[...]
    o_ref[...] = row.reshape(o_ref.shape).astype(o_ref.dtype)


def head_kernel_mxu(x_ref, w1_ref, b1_ref, w2_ref, b2_ref, o_ref):
    """num_classes > 1 path: second layer on the MXU, (TB, C) output."""
    x = x_ref[...].astype(w1_ref.dtype)
    h = jnp.dot(x, w1_ref[...], preferred_element_type=jnp.float32)
    h = jnp.maximum(h + b1_ref[...], 0.0)
    out = jnp.dot(h, w2_ref[...], preferred_element_type=jnp.float32)
    o_ref[...] = (out + b2_ref[...]).astype(o_ref.dtype)


def head_forward(x, w1, b1, w2, b2, *, tile_b=None):
    """x: (B, D_in); w1: (D_in, H); b1: (H,)/(1,H); w2: (H, C); b2: (C,)/(1,C)."""
    B, d_in = x.shape
    hidden = w1.shape[1]
    num_classes = w2.shape[1]

    cap, vmem_limit, want_split = _chip_config()

    # Batch tile: as big as the per-gen cap allows; split into >=2 grid steps
    # only on v7x (2 TCs). Ragged batches are handled by a partial last block
    # (grid = cdiv(B, tile_b)) -- no wrapper-side padding / extra HBM pass.
    if tile_b is None:
        base = pl.cdiv(B, 2) if (want_split and B >= 16) else B
        tile_b = min(cap, max(8, (base // 8) * 8))
    else:
        tile_b = max(8, (int(tile_b) // 8) * 8)
    if B < 8:
        tile_b = B  # block == full batch dim is always legal
    grid_n = pl.cdiv(B, tile_b)

    # Weights / biases are tiny and stay resident in VMEM (constant index_map).
    # Only W1 is pre-cast to bf16 (16 KB); x stays f32 in HBM.
    w1_c = w1.astype(jnp.bfloat16)
    b1_f = jnp.asarray(b1, jnp.float32).reshape(1, hidden)
    b2_f = jnp.asarray(b2, jnp.float32).reshape(1, num_classes)

    cp_kwargs = dict(dimension_semantics=("parallel",))
    if vmem_limit is not None and tile_b > 2048:
        cp_kwargs["vmem_limit_bytes"] = vmem_limit
    compiler_params = pltpu.CompilerParams(**cp_kwargs)

    x_spec = pl.BlockSpec((tile_b, d_in), lambda i: (i, 0))
    w1_spec = pl.BlockSpec((d_in, hidden), lambda i: (0, 0))
    b1_spec = pl.BlockSpec((1, hidden), lambda i: (0, 0))
    b2_spec = pl.BlockSpec((1, num_classes), lambda i: (0, 0))

    if num_classes == 1:
        kernel = head_kernel_c1
        w2_arg = jnp.asarray(w2, jnp.float32).reshape(1, hidden)   # row form
        w2_spec = pl.BlockSpec((1, hidden), lambda i: (0, 0))
        out_shape = jax.ShapeDtypeStruct((grid_n, 1, tile_b), jnp.float32)
        out_spec = pl.BlockSpec((1, 1, tile_b), lambda i: (i, 0, 0))
    else:
        kernel = head_kernel_mxu
        w2_arg = jnp.asarray(w2, jnp.float32)
        w2_spec = pl.BlockSpec((hidden, num_classes), lambda i: (0, 0))
        out_shape = jax.ShapeDtypeStruct((B, num_classes), jnp.float32)
        out_spec = pl.BlockSpec((tile_b, num_classes), lambda i: (i, 0))

    out = pl.pallas_call(
        kernel,
        out_shape=out_shape,
        grid_spec=pltpu.PrefetchScalarGridSpec(
            num_scalar_prefetch=0,
            grid=(grid_n,),
            in_specs=[x_spec, w1_spec, b1_spec, w2_spec, b2_spec],
            out_specs=out_spec,
        ),
        compiler_params=compiler_params,
    )(x, w1_c, b1_f, w2_arg, b2_f)

    if num_classes == 1:
        # Lane-dense (grid_n, 1, tile_b) -> (B, 1); flatten + slice are free.
        out = out.reshape(grid_n * tile_b)[:B].reshape(B, 1)
    return out


def init_params(key, head_elements, num_classes=1):
    # Deterministic synthetic init (PyTorch-style uniform bounds), stored as
    # (in_features, out_features) so the kernel needs no transposes.
    k1, k2, k3, k4 = jax.random.split(key, 4)
    bound1 = 1.0 / (head_elements ** 0.5)
    bound2 = 1.0 / (256 ** 0.5)
    w1 = jax.random.uniform(k1, (head_elements, 256), jnp.float32, -bound1, bound1)
    b1 = jax.random.uniform(k2, (1, 256), jnp.float32, -bound1, bound1)
    w2 = jax.random.uniform(k3, (256, num_classes), jnp.float32, -bound2, bound2)
    b2 = jax.random.uniform(k4, (1, num_classes), jnp.float32, -bound2, bound2)
    return w1, b1, w2, b2


def _reference(x, w1, b1, w2, b2):
    return jnp.maximum(x @ w1 + b1, 0.0) @ w2 + b2


if __name__ == "__main__":
    head_elements = 32

    key = jax.random.PRNGKey(0)
    kx, kp, kx2, kp2 = jax.random.split(key, 4)

    # --- num_classes == 1 (lane-dense output path) ---
    w1, b1, w2, b2 = init_params(kp, head_elements, num_classes=1)

    # Small, aligned batch (single grid step).
    batch = 8
    x = jax.random.normal(kx, (batch, head_elements), jnp.float32)
    out = jax.block_until_ready(head_forward(x, w1, b1, w2, b2))
    ref = _reference(x, w1, b1, w2, b2)
    assert out.shape == (batch, 1)
    # bf16 first-layer operands -> slightly looser tolerance vs f32 reference.
    assert jnp.allclose(out, ref, atol=2e-2, rtol=2e-2)

    # Ragged batch exercising the partial-last-block path (no padding pass).
    batch2 = 100
    x2 = jax.random.normal(kx2, (batch2, head_elements), jnp.float32)
    out2 = jax.block_until_ready(head_forward(x2, w1, b1, w2, b2, tile_b=64))
    ref2 = _reference(x2, w1, b1, w2, b2)
    assert out2.shape == (batch2, 1)
    assert jnp.allclose(out2, ref2, atol=2e-2, rtol=2e-2)

    # --- num_classes > 1 (MXU second-layer path) ---
    w1m, b1m, w2m, b2m = init_params(kp2, head_elements, num_classes=3)
    out3 = jax.block_until_ready(head_forward(x, w1m, b1m, w2m, b2m))
    ref3 = _reference(x, w1m, b1m, w2m, b2m)
    assert out3.shape == (batch, 3)
    assert jnp.allclose(out3, ref3, atol=2e-2, rtol=2e-2)

    print("KERNEL_OK")
</pallas_src>

<mosaic_0001>
module attributes {stable_mosaic.version = 11 : i64} {
  func.func @head_kernel_c1(%arg0: i32, %arg1: memref<8x32xf32, #tpu.memory_space<vmem>>, %arg2: memref<32x256xbf16, #tpu.memory_space<vmem>>, %arg3: memref<1x256xf32, #tpu.memory_space<vmem>>, %arg4: memref<1x256xf32, #tpu.memory_space<vmem>>, %arg5: memref<1x1xf32, #tpu.memory_space<vmem>>, %arg6: memref<1x1x8xf32, #tpu.memory_space<vmem>>) attributes {dimension_semantics = [#tpu.dimension_semantics<parallel>], iteration_bounds = array<i64: 1>, scalar_prefetch = 0 : i64, scratch_operands = 0 : i64, tpu.core_type = #tpu.core_type<tc>, window_params = [{transform_indices = @transform_0, window_bounds = array<i64: 8, 32>}, {pipeline_mode = #tpu.pipeline_mode<synchronous>, transform_indices = @transform_1, window_bounds = array<i64: 32, 256>}, {pipeline_mode = #tpu.pipeline_mode<synchronous>, transform_indices = @transform_2, window_bounds = array<i64: 1, 256>}, {pipeline_mode = #tpu.pipeline_mode<synchronous>, transform_indices = @transform_3, window_bounds = array<i64: 1, 256>}, {pipeline_mode = #tpu.pipeline_mode<synchronous>, transform_indices = @transform_4, window_bounds = array<i64: 1, 1>}, {transform_indices = @transform_5, window_bounds = array<i64: 1, 1, 8>}]} {
    %c0 = arith.constant 0 : index
    %c0_0 = arith.constant 0 : index
    %0 = vector.load %arg1[%c0, %c0_0] : memref<8x32xf32, #tpu.memory_space<vmem>>, vector<8x32xf32>
    %1 = arith.truncf %0 : vector<8x32xf32> to vector<8x32xbf16>
    %c0_1 = arith.constant 0 : index
    %c0_2 = arith.constant 0 : index
    %2 = vector.load %arg2[%c0_1, %c0_2] : memref<32x256xbf16, #tpu.memory_space<vmem>>, vector<32x256xbf16>
    %cst = arith.constant dense<0.000000e+00> : vector<8x256xf32>
    %3 = tpu.matmul %1, %2, %cst {dimension_numbers = #tpu.dot_dimension_numbers<[1], [0], [0], [1], [0, 0, 1, 1], [], []>} : vector<8x32xbf16>, vector<32x256xbf16>, vector<8x256xf32> -> vector<8x256xf32>
    %c0_3 = arith.constant 0 : index
    %c0_4 = arith.constant 0 : index
    %4 = vector.load %arg3[%c0_3, %c0_4] : memref<1x256xf32, #tpu.memory_space<vmem>>, vector<1x256xf32>
    %5 = vector.broadcast %4 : vector<1x256xf32> to vector<8x256xf32>
    %6 = arith.addf %3, %5 : vector<8x256xf32>
    %cst_5 = arith.constant 0.000000e+00 : f32
    %7 = vector.broadcast %cst_5 : f32 to vector<8x256xf32>
    %8 = arith.maximumf %6, %7 : vector<8x256xf32>
    %c0_6 = arith.constant 0 : index
    %c0_7 = arith.constant 0 : index
    %9 = vector.load %arg4[%c0_6, %c0_7] : memref<1x256xf32, #tpu.memory_space<vmem>>, vector<1x256xf32>
    "tpu.trace_start"() <{level = 10 : i32, message = "ch,bh->cb"}> : () -> ()
    %cst_8 = arith.constant dense<0.000000e+00> : vector<1x8xf32>
    %10 = tpu.matmul %9, %8, %cst_8 {dimension_numbers = #tpu.dot_dimension_numbers<[1], [1], [0], [0], [0, 0, 1, 0], [], []>} : vector<1x256xf32>, vector<8x256xf32>, vector<1x8xf32> -> vector<1x8xf32>
    "tpu.trace_stop"() : () -> ()
    %c0_9 = arith.constant 0 : index
    %c0_10 = arith.constant 0 : index
    %11 = vector.load %arg5[%c0_9, %c0_10] : memref<1x1xf32, #tpu.memory_space<vmem>>, vector<1x1xf32>
    %12 = vector.broadcast %11 : vector<1x1xf32> to vector<1x8xf32>
    %13 = arith.addf %10, %12 : vector<1x8xf32>
    %14 = vector.shape_cast %13 : vector<1x8xf32> to vector<1x1x8xf32>
    %c0_11 = arith.constant 0 : index
    %c0_12 = arith.constant 0 : index
    %c0_13 = arith.constant 0 : index
    %15 = vector.load %arg6[%c0_11, %c0_12, %c0_13] : memref<1x1x8xf32, #tpu.memory_space<vmem>>, vector<1x1x8xf32>
    tpu.vector_store %arg6[%c0_11, %c0_12, %c0_13], %14 {strides = array<i32>} : memref<1x1x8xf32, #tpu.memory_space<vmem>>, vector<1x1x8xf32>,
    return
  }
  func.func @transform_0(%arg0: i32) -> (i32, i32) {
    %c0_i32 = arith.constant 0 : i32
    %c0_i32_0 = arith.constant 0 : i32
    return %arg0, %c0_i32 : i32, i32
  }
  func.func @transform_1(%arg0: i32) -> (i32, i32) {
    %c0_i32 = arith.constant 0 : i32
    %c0_i32_0 = arith.constant 0 : i32
    %c0_i32_1 = arith.constant 0 : i32
    return %c0_i32, %c0_i32_0 : i32, i32
  }
  func.func @transform_2(%arg0: i32) -> (i32, i32) {
    %c0_i32 = arith.constant 0 : i32
    %c0_i32_0 = arith.constant 0 : i32
    %c0_i32_1 = arith.constant 0 : i32
    return %c0_i32, %c0_i32_0 : i32, i32
  }
  func.func @transform_3(%arg0: i32) -> (i32, i32) {
    %c0_i32 = arith.constant 0 : i32
    %c0_i32_0 = arith.constant 0 : i32
    %c0_i32_1 = arith.constant 0 : i32
    return %c0_i32, %c0_i32_0 : i32, i32
  }
  func.func @transform_4(%arg0: i32) -> (i32, i32) {
    %c0_i32 = arith.constant 0 : i32
    %c0_i32_0 = arith.constant 0 : i32
    %c0_i32_1 = arith.constant 0 : i32
    return %c0_i32, %c0_i32_0 : i32, i32
  }
  func.func @transform_5(%arg0: i32) -> (i32, i32, i32) {
    %c0_i32 = arith.constant 0 : i32
    %c0_i32_0 = arith.constant 0 : i32
    %c0_i32_1 = arith.constant 0 : i32
    return %arg0, %c0_i32, %c0_i32_0 : i32, i32, i32
  }
}

</mosaic_0001>

<bundles_post_ra>
// kernel: tpu_custom_call.1
= control target key start
LH: loop header
LB: loop body
LE: loop exit
PB: predicated region body
PF: predicated region fallthrough
CT: control target
= control target key end

     0   :  { %s423_s0 = inlined_call_operand.hbm [shape: f32[8,32], index: 0, kind: input, shape index: {}]   ;;  %s424_s1 = inlined_call_operand.hbm [shape: bf16[32,256], index: 1, kind: input, shape index: {}]   ;;  %s425_s2 = inlined_call_operand.vmem [shape: f32[1,256], index: 2, kind: input, shape index: {}]   ;;  %s426_s3 = inlined_call_operand.vmem [shape: f32[1,256], index: 3, kind: input, shape index: {}]   ;;  %s427_s4 = inlined_call_operand.<no memory space> [shape: f32[1,1], index: 4, kind: input, shape index: {}]   ;;  %s428_s5 = inlined_call_operand.hbm [shape: f32[1,1,8], index: 5, kind: output, shape index: {}]  }
   0x1   :  { %v10_v0 = vstv %s427_s4 }
   0x2   :  { %11 = vst [vmem:[#allocation2] sm:$0x1] %v10_v0 }
   0x3   :  { %12 = vsyncpa [#allocation4], 0 }
   0x4   :  { %13 = vsyncpa [#allocation7], 0 }
   0x5   :  { %14 = vsyncpa [#allocation5], 0  ;;  %s335_s20 = smov [#allocation3]   ;;  %s336_s22 = smov [#allocation6]  }
   0x6   :  { %s21_s21 = sshll.u32 %s335_s20, 4  ;;  %s30_s23 = sshll.u32 %s336_s22, 4  ;;  %s22_s21 = int_to_ptr.vmem [resolvable:$true] %s21_s21  ;;  %s374_s23 = int_to_ptr.vmem [resolvable:$true] %s30_s23 }
   0x7   :  { %s263_s26 = scalar_lea.hbm %s423_s0, 128 }
   0x8   :  { %p264_p0 = scmp.ne.s32.totalorder %s423_s0, %s263_s26  ;;  %p267_p1 = scmp.lt.u32.totalorder %s263_s26, %s423_s0 }
   0xa   :  { %p269_p2 = pnand %p267_p1, %p264_p0 }
   0xc   :  { %272 = shalt.err (!%p269_p2)
}
   0xd   :  { %s273_s30 = scalar_lea.vmem %s22_s21, 128  ;;  %p278_p4 = scmp.lt.s32.totalorder %s22_s21, %s22_s21 }
   0xe   :  { %p274_p3 = scmp.ne.s32.totalorder %s22_s21, %s273_s30  ;;  %p279_p5 = scmp.lt.s32.totalorder %s273_s30, %s273_s30 }
  0x10   :  { %p280_p6 = por %p279_p5, %p278_p4 }
  0x12   :  { %p281_p7 = pnand %p280_p6, %p274_p3 }
  0x14   :  { %284 = shalt.err (!%p281_p7)
}
  0x15   :  { %24 = dma.hbm_to_vmem [thread:$0]  %s423_s0, 128, %s22_s21, [#allocation4]  }
  0x16   :  { %s285_s10 = scalar_lea.hbm %s424_s1, 512 }
  0x17   :  { %p286_p8 = scmp.ne.s32.totalorder %s424_s1, %s285_s10  ;;  %p289_p9 = scmp.lt.u32.totalorder %s285_s10, %s424_s1 }
  0x19   :  { %p291_p10 = pnand %p289_p9, %p286_p8 }
  0x1b   :  { %294 = shalt.err (!%p291_p10)
}
  0x1c   :  { %s295_s15 = scalar_lea.vmem %s374_s23, 512  ;;  %p300_p12 = scmp.lt.s32.totalorder %s374_s23, %s374_s23 }
  0x1d   :  { %p296_p11 = scmp.ne.s32.totalorder %s374_s23, %s295_s15  ;;  %p301_p13 = scmp.lt.s32.totalorder %s295_s15, %s295_s15 }
  0x1f   :  { %p302_p0 = por %p301_p13, %p300_p12 }
  0x21   :  { %p303_p1 = pnand %p302_p0, %p296_p11 }
  0x23   :  { %306 = shalt.err (!%p303_p1)
}
  0x24   :  { %s337_s0 = smov 128   ;;  %s338_s16 = smov 8  }
  0x25   :  { %36 = dma.hbm_to_vmem [thread:$0]  %s424_s1, 512, %s374_s23, [#allocation7], %s337_s0, %s337_s0, %s338_s16  }
  0x26   :  { %329 = dma.done.wait [#allocation4], 128  }
  0x27   :  { %330 = vsyncadd [#allocation4], 4294967168 }
  0x28   :  { %331 = dma.done.wait [#allocation7], 512  }
  0x29   :  { %332 = vsyncadd [#allocation7], 4294966784  ;;  %v339_v1 = vmov 0   ;;  %v257_v2 = vld [vmem:[#allocation6 + $0x4] ss:$8 sps:$4 sm:$0xff]   ;;  %v50_v6 = vld [vmem:[#allocation3] sm:$0xff]  ;;  %v58_v8 = vlaneseq }
  0x2a   :  { %124 = vmatprep.mubr.bf16.mxu0 %v339_v1  ;;  %256 = vset.pattern.permute.xlu0 %v339_v1  ;;  %v259_v3 = vld [vmem:[#allocation6] ss:$8 sps:$4 sm:$0xff]   ;;  %v260_v4 = vld [vmem:[#allocation6 + $0x14] ss:$8 sps:$4 sm:$0xff]   ;;  %v262_v5 = vld [vmem:[#allocation6 + $0x10] ss:$8 sps:$4 sm:$0xff]   ;;  %v51_v7 = vpack.c.bf16 %v50_v6, %v50_v6 }
  0x2b   :  { %92 = vmatprep.subr.bf16.mxu0 %v257_v2  ;;  %vm88_vm0 = vcmask 261120   ;;  %v59_v9 = vshrl.u32 %v58_v8, 7  ;;  %v135_v11 = vld [vmem:[%s426_s3] sm:$0x3]  ;;  %s340_s3 = smov [#allocation8]   ;;  %vm227_vm1 = vcmask 57344  }
  0x2c   :  { %93 = vmatpush1.bf16.msra.mxu0 %v259_v3  ;;  %v136_v13 = vld [vmem:[#allocation2] sm:$0x1]  ;;  %s235_s22 = sshll.u32 %s340_s3, 4  ;;  %s236_s22 = int_to_ptr.vmem [resolvable:$true] %s235_s22 }
  0x2d   :  { %94 = vmatprep.subr.bf16.mxu0 %v260_v4  ;;  %v64_v10 = vsub.s32 1, %v59_v9  ;;  %139 = vperm.xlu0 %256, %v136_v13   ;;  %v60_v14 = vsub.s32 0, %v59_v9  ;;  %v56_v15 = vld [vmem:[%s425_s2] sm:$0x3]  ;;  %s307_s2 = scalar_lea.vmem %s236_s22, 16  ;;  %s311_s23 = scalar_lea.vmem %s236_s22, 32 }
  0x2e   :  { %p308_p2 = scmp.ne.s32.totalorder %s236_s22, %s307_s2  ;;  %p312_p3 = scmp.lt.s32.totalorder %s236_s22, %s236_s22 }
  0x2f   :  { %v154_v12 = vrot.slane %v135_v11, %v64_v10  ;;  %v61_v16 = vrot.slane %v56_v15, %v60_v14  ;;  %v65_v17 = vrot.slane %v56_v15, %v64_v10  ;;  %v150_v26 = vrot.slane %v135_v11, %v60_v14  ;;  %p313_p4 = scmp.lt.s32.totalorder %s311_s23, %s307_s2 }
  0x30   :  { %95 = vmatpush1.bf16.msra.mxu0 %v262_v5 }
  0x31   :  { %221 = vmatprep.mubr.f32.mxu1 %v154_v12  ;;  %p314_p5 = por %p313_p4, %p312_p3 }
  0x33   :  { %249 = vmatmul.mubr.msk.bf16.vlgmr.msra.gmra.mrb[0].mxu0 %vm88_vm0, %v51_v7  ;;  %p315_p6 = pnand %p314_p5, %p308_p2 }
  0xac   :  { %v140_v27 = vpop.permute.xlu0 %139 }
  0xad   :  { %v145_v28 = vrot.slane %v140_v27, %v60_v14 }
 0x106   :  { %v126_v18 = vpop.f32.mrb[0].mxu0 }
 0x107   :  { %v127_v19 = vadd.f32 %v126_v18, %v61_v16  ;;  %v128_v20 = vpop.f32.mrb[1].mxu0 }
 0x108   :  { %v130_v21 = vpop.f32.mrb[2].mxu0  ;;  %v129_v22 = vadd.f32 %v128_v20, %v65_v17 }
 0x109   :  { %v131_v23 = vpop.f32.mrb[3].mxu0  ;;  %v133_v25 = vmax.f32 %v127_v19, 0.0 }
 0x10a   :  { %v134_v24 = vmax.f32 %v129_v22, 0.0 }
 0x10c   :  { %157 = vmatprep.subr.mxu1 %v134_v24 }
 0x10d   :  { %158 = vmatpush1.xpose.msra.mxu1 %v133_v25 }
 0x110   :  { %222 = vmatmul.mubr.f32.vlgmr.msra.gmra.mrb[0].mxu1 %v150_v26 }
 0x1e3   :  { %v223_v29 = vpop.f32.mrb[0].mxu1 }
 0x1e4   :  { %v224_v30 = vadd.f32 %v223_v29, %v145_v28  ;;  %v225_v31 = vpop.f32.mrb[1].mxu1 }
 0x1e6   :  { %228 = vst.msk [vmem:[#allocation8] sm:$0x1] %vm227_vm1, %v224_v30 }
 0x1e7   :  { %318 = shalt.err (!%p315_p6)
}
 0x1e8   :  { %s319_s26 = scalar_lea.hbm %s428_s5, 16 }
 0x1e9   :  { %p320_p7 = scmp.ne.s32.totalorder %s428_s5, %s319_s26  ;;  %p323_p8 = scmp.lt.u32.totalorder %s319_s26, %s428_s5 }
 0x1eb   :  { %p325_p9 = pnand %p323_p8, %p320_p7 }
 0x1ed   :  { %328 = shalt.err (!%p325_p9)
}
 0x1ee   :  { %238 = dma.vmem_to_hbm [thread:$0]  %s236_s22, 16, %s428_s5, [#allocation5]  }
 0x1ef   :  { %333 = dma.done.wait [#allocation5], 16  }
 0x1f0   :  { %334 = vsyncadd [#allocation5], 4294967280 }
 0x1f1   :  { %242 = vsyncpa [#allocation4], 1 }
 0x1f2   :  { %243 = vsyncpa [#allocation7], 1 }
 0x1f3   :  { %244 = vsyncpa [#allocation5], 1 }

</bundles_post_ra>
